<compile_context>
chip_gen: v7x
topology: tpu7x:2x2x1
jax: 0.10.0
libtpu: 0.0.40
codegen_flags: <defaults>
</compile_context>

<pallas_src>
import functools

import jax
import jax.numpy as jnp
import numpy as np
from jax.experimental import pallas as pl
from jax.experimental.pallas import tpu as pltpu

_TB_MAX = 256  # batch rows streamed per grid step (multiple of sublane granule)


def _round_up(x: int, m: int) -> int:
    return ((x + m - 1) // m) * m


def _feature_granule() -> int:
    """256-align feature dims for the 2x256x256 MXU (v6e/v7x); 128 on v5e."""
    try:
        kind = jax.devices()[0].device_kind.lower()
        if "v5 lite" in kind or "v5lite" in kind or "v5e" in kind:
            return 128
    except Exception:
        pass
    return 256


# ----------------------------- Pallas kernel --------------------------------
def _fused_mlp_kernel(*refs, n_hidden: int):
    """Fused MLP on one (TB, F_in_p) activation tile; weights VMEM-resident.

      refs (n_hidden > 0):
        x_ref     (TB, F_in_p)        bf16
        w_in_ref  (F_in_p, Wp)        bf16
        b_in_ref  (1, Wp)             f32
        w_hid_ref (n_hidden, Wp, Wp)  bf16   (stacked hidden layers)
        b_hid_ref (n_hidden, 1, Wp)   f32
        w_out_ref (Wp, Cp)            bf16
        b_out_ref (1, Cp)             f32
        o_ref     (TB, Cp)            f32
    All matmuls accumulate in f32 on the MXU; ReLU epilogue stays f32 (VPU),
    then the activation is cast back to bf16 for the next matmul.
    """
    if n_hidden > 0:
        (x_ref, w_in_ref, b_in_ref, w_hid_ref, b_hid_ref,
         w_out_ref, b_out_ref, o_ref) = refs
    else:
        x_ref, w_in_ref, b_in_ref, w_out_ref, b_out_ref, o_ref = refs
        w_hid_ref = b_hid_ref = None

    # First layer + ReLU.
    h = x_ref[...]
    y = jnp.dot(h, w_in_ref[...], preferred_element_type=jnp.float32)
    y = y + b_in_ref[...]
    h = jnp.maximum(y, 0.0).astype(jnp.bfloat16)

    # Hidden layers (static unroll over the stacked layer axis).
    for i in range(n_hidden):
        y = jnp.dot(h, w_hid_ref[i], preferred_element_type=jnp.float32)
        y = y + b_hid_ref[i]
        h = jnp.maximum(y, 0.0).astype(jnp.bfloat16)

    # Output layer (no ReLU).
    y = jnp.dot(h, w_out_ref[...], preferred_element_type=jnp.float32)
    y = y + b_out_ref[...]
    o_ref[...] = y.astype(o_ref.dtype)


def _fused_call(x, packed):
    """Batch-gridded pallas_call: stream activations, keep weights resident."""
    B, f_in_p = x.shape
    w_in, b_in = packed["w_in"], packed["b_in"]
    w_hid, b_hid = packed["w_hid"], packed["b_hid"]
    w_out, b_out = packed["w_out"], packed["b_out"]
    n_hidden = 0 if w_hid is None else w_hid.shape[0]
    wp = w_in.shape[1]
    c_p = w_out.shape[1]

    # Batch tile: full-array block for small B (always layout-legal), else a
    # fixed 256-row tile (partial last block handled by Pallas masking).
    tb = B if B <= _TB_MAX else _TB_MAX
    grid = (pl.cdiv(B, tb),)

    in_arrays = [x, w_in, b_in]
    in_specs = [
        pl.BlockSpec((tb, f_in_p), lambda b: (b, 0)),      # streamed
        pl.BlockSpec(w_in.shape, lambda b: (0, 0)),        # resident
        pl.BlockSpec(b_in.shape, lambda b: (0, 0)),        # resident
    ]
    if n_hidden > 0:
        in_arrays += [w_hid, b_hid]
        in_specs += [
            pl.BlockSpec(w_hid.shape, lambda b: (0, 0, 0)),   # resident
            pl.BlockSpec(b_hid.shape, lambda b: (0, 0, 0)),   # resident
        ]
    in_arrays += [w_out, b_out]
    in_specs += [
        pl.BlockSpec(w_out.shape, lambda b: (0, 0)),       # resident
        pl.BlockSpec(b_out.shape, lambda b: (0, 0)),       # resident
    ]
    out_spec = pl.BlockSpec((tb, c_p), lambda b: (b, 0))   # streamed, lane-dense

    # Explicit VMEM budget: resident weights/biases + double-buffered x/out
    # tiles + headroom for per-layer f32 intermediates.
    weight_bytes = sum(int(np.prod(a.shape)) * a.dtype.itemsize
                       for a in in_arrays[1:])
    stream_bytes = 2 * (tb * f_in_p * 2 + tb * c_p * 4)    # double buffers
    scratch_bytes = 6 * tb * max(wp, c_p) * 4              # intermediates headroom
    vmem_limit = int(min(max(weight_bytes + stream_bytes + scratch_bytes
                             + (4 << 20), 16 << 20), 100 << 20))

    flops = 2 * B * (f_in_p * wp + n_hidden * wp * wp + wp * c_p)
    bytes_accessed = x.size * 2 + weight_bytes + B * c_p * 4

    return pl.pallas_call(
        functools.partial(_fused_mlp_kernel, n_hidden=n_hidden),
        out_shape=jax.ShapeDtypeStruct((B, c_p), jnp.float32),
        grid=grid,
        in_specs=in_specs,
        out_specs=out_spec,
        compiler_params=pltpu.CompilerParams(
            dimension_semantics=("parallel",),     # shard batch across v7x TCs
            vmem_limit_bytes=vmem_limit,
        ),
        cost_estimate=pl.CostEstimate(
            flops=flops, transcendentals=0, bytes_accessed=bytes_accessed),
    )(*in_arrays)


# ----------------------------- Parameter init -------------------------------
def _kaiming_uniform(key, fan_in, fan_out):
    # nn.init.kaiming_uniform_ with default a=0 (gain=sqrt(2)):
    # bound = sqrt(6 / fan_in).  Stored as (in, out) so the kernel does x @ W,
    # equivalent to PyTorch's x @ W.T with W of shape (out, in).
    bound = float(np.sqrt(6.0 / fan_in))
    return jax.random.uniform(
        key, (fan_in, fan_out), minval=-bound, maxval=bound, dtype=jnp.float32
    )


def _default_bias(key, fan_in, fan_out):
    # nn.Linear default bias init: U(-1/sqrt(fan_in), 1/sqrt(fan_in))
    bound = float(1.0 / np.sqrt(fan_in))
    return jax.random.uniform(
        key, (fan_out,), minval=-bound, maxval=bound, dtype=jnp.float32
    )


def init_params(key, nchannels, img_dim, nclasses, width, nhidden):
    """Unpadded f32 parameters, matching the PyTorch module's layer stack."""
    in_features = nchannels * img_dim * img_dim
    dims = [in_features] + [width] * (nhidden + 1) + [nclasses]
    params = []
    for i in range(len(dims) - 1):
        key, kw, kb = jax.random.split(key, 3)
        w = _kaiming_uniform(kw, dims[i], dims[i + 1])
        b = _default_bias(kb, dims[i], dims[i + 1])
        params.append((w, b))
    return params


def pad_and_pack_params(params, granule):
    """One-time padding to MXU-aligned bf16 weights; hidden layers stacked.

    Padded rows/cols are zeros, so the padded network computes exactly the
    same logits in its leading (real) columns.
    """
    def pad_w(w):
        fi, fo = w.shape
        fi_p, fo_p = _round_up(fi, granule), _round_up(fo, granule)
        return (jnp.zeros((fi_p, fo_p), jnp.bfloat16)
                .at[:fi, :fo].set(w.astype(jnp.bfloat16)))

    def pad_b(b, fo_p):
        return jnp.zeros((1, fo_p), jnp.float32).at[0, : b.shape[0]].set(b)

    w_in = pad_w(params[0][0])
    b_in = pad_b(params[0][1], w_in.shape[1])
    w_out = pad_w(params[-1][0])
    b_out = pad_b(params[-1][1], w_out.shape[1])
    hidden = params[1:-1]
    if hidden:
        w_hid = jnp.stack([pad_w(w) for w, _ in hidden])                    # (nh, Wp, Wp)
        b_hid = jnp.stack([pad_b(b, w_hid.shape[2]) for _, b in hidden])    # (nh, 1, Wp)
    else:
        w_hid = b_hid = None
    return dict(w_in=w_in, b_in=b_in, w_hid=w_hid, b_hid=b_hid,
                w_out=w_out, b_out=b_out)


# ----------------------------- Forward pass ----------------------------------
@functools.partial(jax.jit, static_argnames=("nclasses",))
def network_forward(x_nchw, packed, nclasses):
    B = x_nchw.shape[0]
    x = x_nchw.reshape(B, -1).astype(jnp.bfloat16)   # matches x.view(B, -1)
    f_in = x.shape[1]
    f_in_p = packed["w_in"].shape[0]
    if f_in != f_in_p:
        # Feature-axis padding MUST be zero-filled (garbage * 0 could be NaN).
        x = jnp.pad(x, ((0, 0), (0, f_in_p - f_in)))
    out_p = _fused_call(x, packed)                   # (B, C_p) f32
    return out_p[:, :nclasses]                       # strip feature padding


def reference_forward(x_nchw, params):
    """Pure-JAX reference with the same bf16-in / f32-accumulate precision."""
    x = x_nchw.reshape(x_nchw.shape[0], -1)
    h = x.astype(jnp.bfloat16)
    n = len(params)
    y = None
    for i, (w, b) in enumerate(params):
        y = jnp.dot(h, w.astype(jnp.bfloat16), preferred_element_type=jnp.float32)
        y = y + b[None, :]
        if i < n - 1:
            h = jnp.maximum(y, 0.0).astype(jnp.bfloat16)
    return y


# ----------------------------- Main ------------------------------------------
if __name__ == "__main__":
    # Small, module-consistent shapes.
    batch = 2
    nchannels = 4
    img_dim = 16
    nclasses = 10
    width = 32
    nhidden = 2
    dropout = 0.0          # no Dropout layers added (see constructor)
    init_method = "kaiming_uniform"

    key = jax.random.PRNGKey(0)
    key_x, key_p = jax.random.split(key)

    x = jax.random.normal(
        key_x, (batch, nchannels, img_dim, img_dim), dtype=jnp.float32
    )
    params = init_params(key_p, nchannels, img_dim, nclasses, width, nhidden)
    packed = pad_and_pack_params(params, _feature_granule())

    out = network_forward(x, packed, nclasses)
    jax.block_until_ready(out)

    assert out.shape == (batch, nclasses), out.shape
    assert bool(jnp.all(jnp.isfinite(out)))

    ref = reference_forward(x, params)
    np.testing.assert_allclose(
        np.asarray(out), np.asarray(ref), rtol=2e-2, atol=2e-2
    )

    print("KERNEL_OK")
</pallas_src>

<mosaic_0001>
module attributes {stable_mosaic.version = 11 : i64} {
  func.func @_fused_mlp_kernel(%arg0: i32, %arg1: memref<2x1024xbf16, #tpu.memory_space<vmem>>, %arg2: memref<1024x256xbf16, #tpu.memory_space<vmem>>, %arg3: memref<1x256xf32, #tpu.memory_space<vmem>>, %arg4: memref<2x256x256xbf16, #tpu.memory_space<vmem>>, %arg5: memref<2x1x256xf32, #tpu.memory_space<vmem>>, %arg6: memref<256x256xbf16, #tpu.memory_space<vmem>>, %arg7: memref<1x256xf32, #tpu.memory_space<vmem>>, %arg8: memref<2x256xf32, #tpu.memory_space<vmem>>) attributes {dimension_semantics = [#tpu.dimension_semantics<parallel>], iteration_bounds = array<i64: 1>, scalar_prefetch = 0 : i64, scratch_operands = 0 : i64, tpu.core_type = #tpu.core_type<tc>, window_params = [{transform_indices = @transform_0, window_bounds = array<i64: 2, 1024>}, {pipeline_mode = #tpu.pipeline_mode<synchronous>, transform_indices = @transform_1, window_bounds = array<i64: 1024, 256>}, {pipeline_mode = #tpu.pipeline_mode<synchronous>, transform_indices = @transform_2, window_bounds = array<i64: 1, 256>}, {pipeline_mode = #tpu.pipeline_mode<synchronous>, transform_indices = @transform_3, window_bounds = array<i64: 2, 256, 256>}, {pipeline_mode = #tpu.pipeline_mode<synchronous>, transform_indices = @transform_4, window_bounds = array<i64: 2, 1, 256>}, {pipeline_mode = #tpu.pipeline_mode<synchronous>, transform_indices = @transform_5, window_bounds = array<i64: 256, 256>}, {pipeline_mode = #tpu.pipeline_mode<synchronous>, transform_indices = @transform_6, window_bounds = array<i64: 1, 256>}, {transform_indices = @transform_7, window_bounds = array<i64: 2, 256>}]} {
    %c0 = arith.constant 0 : index
    %c0_0 = arith.constant 0 : index
    %0 = vector.load %arg1[%c0, %c0_0] : memref<2x1024xbf16, #tpu.memory_space<vmem>>, vector<2x1024xbf16>
    %c0_1 = arith.constant 0 : index
    %c0_2 = arith.constant 0 : index
    %1 = vector.load %arg2[%c0_1, %c0_2] : memref<1024x256xbf16, #tpu.memory_space<vmem>>, vector<1024x256xbf16>
    %cst = arith.constant dense<0.000000e+00> : vector<2x256xf32>
    %2 = tpu.matmul %0, %1, %cst {dimension_numbers = #tpu.dot_dimension_numbers<[1], [0], [0], [1], [0, 0, 1, 1], [], []>} : vector<2x1024xbf16>, vector<1024x256xbf16>, vector<2x256xf32> -> vector<2x256xf32>
    %c0_3 = arith.constant 0 : index
    %c0_4 = arith.constant 0 : index
    %3 = vector.load %arg3[%c0_3, %c0_4] : memref<1x256xf32, #tpu.memory_space<vmem>>, vector<1x256xf32>
    %4 = vector.broadcast %3 : vector<1x256xf32> to vector<2x256xf32>
    %5 = arith.addf %2, %4 : vector<2x256xf32>
    %cst_5 = arith.constant 0.000000e+00 : f32
    %6 = vector.broadcast %cst_5 : f32 to vector<2x256xf32>
    %7 = arith.maximumf %5, %6 : vector<2x256xf32>
    %8 = arith.truncf %7 : vector<2x256xf32> to vector<2x256xbf16>
    %c0_6 = arith.constant 0 : index
    %c0_7 = arith.constant 0 : index
    %c0_8 = arith.constant 0 : index
    %9 = vector.load %arg4[%c0_6, %c0_7, %c0_8] : memref<2x256x256xbf16, #tpu.memory_space<vmem>>, vector<1x256x256xbf16>
    %10 = vector.shape_cast %9 : vector<1x256x256xbf16> to vector<256x256xbf16>
    %cst_9 = arith.constant dense<0.000000e+00> : vector<2x256xf32>
    %11 = tpu.matmul %8, %10, %cst_9 {dimension_numbers = #tpu.dot_dimension_numbers<[1], [0], [0], [1], [0, 0, 1, 1], [], []>} : vector<2x256xbf16>, vector<256x256xbf16>, vector<2x256xf32> -> vector<2x256xf32>
    %c0_10 = arith.constant 0 : index
    %c0_11 = arith.constant 0 : index
    %c0_12 = arith.constant 0 : index
    %12 = vector.load %arg5[%c0_10, %c0_11, %c0_12] : memref<2x1x256xf32, #tpu.memory_space<vmem>>, vector<1x1x256xf32>
    %13 = vector.shape_cast %12 : vector<1x1x256xf32> to vector<1x256xf32>
    %14 = vector.broadcast %13 : vector<1x256xf32> to vector<2x256xf32>
    %15 = arith.addf %11, %14 : vector<2x256xf32>
    %cst_13 = arith.constant 0.000000e+00 : f32
    %16 = vector.broadcast %cst_13 : f32 to vector<2x256xf32>
    %17 = arith.maximumf %15, %16 : vector<2x256xf32>
    %18 = arith.truncf %17 : vector<2x256xf32> to vector<2x256xbf16>
    %c1 = arith.constant 1 : index
    %c0_14 = arith.constant 0 : index
    %c0_15 = arith.constant 0 : index
    %19 = vector.load %arg4[%c1, %c0_14, %c0_15] : memref<2x256x256xbf16, #tpu.memory_space<vmem>>, vector<1x256x256xbf16>
    %20 = vector.shape_cast %19 : vector<1x256x256xbf16> to vector<256x256xbf16>
    %cst_16 = arith.constant dense<0.000000e+00> : vector<2x256xf32>
    %21 = tpu.matmul %18, %20, %cst_16 {dimension_numbers = #tpu.dot_dimension_numbers<[1], [0], [0], [1], [0, 0, 1, 1], [], []>} : vector<2x256xbf16>, vector<256x256xbf16>, vector<2x256xf32> -> vector<2x256xf32>
    %c1_17 = arith.constant 1 : index
    %c0_18 = arith.constant 0 : index
    %c0_19 = arith.constant 0 : index
    %22 = vector.load %arg5[%c1_17, %c0_18, %c0_19] : memref<2x1x256xf32, #tpu.memory_space<vmem>>, vector<1x1x256xf32>
    %23 = vector.shape_cast %22 : vector<1x1x256xf32> to vector<1x256xf32>
    %24 = vector.broadcast %23 : vector<1x256xf32> to vector<2x256xf32>
    %25 = arith.addf %21, %24 : vector<2x256xf32>
    %cst_20 = arith.constant 0.000000e+00 : f32
    %26 = vector.broadcast %cst_20 : f32 to vector<2x256xf32>
    %27 = arith.maximumf %25, %26 : vector<2x256xf32>
    %28 = arith.truncf %27 : vector<2x256xf32> to vector<2x256xbf16>
    %c0_21 = arith.constant 0 : index
    %c0_22 = arith.constant 0 : index
    %29 = vector.load %arg6[%c0_21, %c0_22] : memref<256x256xbf16, #tpu.memory_space<vmem>>, vector<256x256xbf16>
    %cst_23 = arith.constant dense<0.000000e+00> : vector<2x256xf32>
    %30 = tpu.matmul %28, %29, %cst_23 {dimension_numbers = #tpu.dot_dimension_numbers<[1], [0], [0], [1], [0, 0, 1, 1], [], []>} : vector<2x256xbf16>, vector<256x256xbf16>, vector<2x256xf32> -> vector<2x256xf32>
    %c0_24 = arith.constant 0 : index
    %c0_25 = arith.constant 0 : index
    %31 = vector.load %arg7[%c0_24, %c0_25] : memref<1x256xf32, #tpu.memory_space<vmem>>, vector<1x256xf32>
    %32 = vector.broadcast %31 : vector<1x256xf32> to vector<2x256xf32>
    %33 = arith.addf %30, %32 : vector<2x256xf32>
    %c0_26 = arith.constant 0 : index
    %c0_27 = arith.constant 0 : index
    %34 = vector.load %arg8[%c0_26, %c0_27] : memref<2x256xf32, #tpu.memory_space<vmem>>, vector<2x256xf32>
    tpu.vector_store %arg8[%c0_26, %c0_27], %33 {strides = array<i32>} : memref<2x256xf32, #tpu.memory_space<vmem>>, vector<2x256xf32>,
    return
  }
  func.func @transform_0(%arg0: i32) -> (i32, i32) {
    %c0_i32 = arith.constant 0 : i32
    %c0_i32_0 = arith.constant 0 : i32
    return %arg0, %c0_i32 : i32, i32
  }
  func.func @transform_1(%arg0: i32) -> (i32, i32) {
    %c0_i32 = arith.constant 0 : i32
    %c0_i32_0 = arith.constant 0 : i32
    %c0_i32_1 = arith.constant 0 : i32
    return %c0_i32, %c0_i32_0 : i32, i32
  }
  func.func @transform_2(%arg0: i32) -> (i32, i32) {
    %c0_i32 = arith.constant 0 : i32
    %c0_i32_0 = arith.constant 0 : i32
    %c0_i32_1 = arith.constant 0 : i32
    return %c0_i32, %c0_i32_0 : i32, i32
  }
  func.func @transform_3(%arg0: i32) -> (i32, i32, i32) {
    %c0_i32 = arith.constant 0 : i32
    %c0_i32_0 = arith.constant 0 : i32
    %c0_i32_1 = arith.constant 0 : i32
    %c0_i32_2 = arith.constant 0 : i32
    return %c0_i32, %c0_i32_0, %c0_i32_1 : i32, i32, i32
  }
  func.func @transform_4(%arg0: i32) -> (i32, i32, i32) {
    %c0_i32 = arith.constant 0 : i32
    %c0_i32_0 = arith.constant 0 : i32
    %c0_i32_1 = arith.constant 0 : i32
    %c0_i32_2 = arith.constant 0 : i32
    return %c0_i32, %c0_i32_0, %c0_i32_1 : i32, i32, i32
  }
  func.func @transform_5(%arg0: i32) -> (i32, i32) {
    %c0_i32 = arith.constant 0 : i32
    %c0_i32_0 = arith.constant 0 : i32
    %c0_i32_1 = arith.constant 0 : i32
    return %c0_i32, %c0_i32_0 : i32, i32
  }
  func.func @transform_6(%arg0: i32) -> (i32, i32) {
    %c0_i32 = arith.constant 0 : i32
    %c0_i32_0 = arith.constant 0 : i32
    %c0_i32_1 = arith.constant 0 : i32
    return %c0_i32, %c0_i32_0 : i32, i32
  }
  func.func @transform_7(%arg0: i32) -> (i32, i32) {
    %c0_i32 = arith.constant 0 : i32
    %c0_i32_0 = arith.constant 0 : i32
    return %arg0, %c0_i32 : i32, i32
  }
}

</mosaic_0001>

<bundles_post_ra>
// kernel: network_forward.1
= control target key start
LH: loop header
LB: loop body
LE: loop exit
PB: predicated region body
PF: predicated region fallthrough
CT: control target
= control target key end

     0   :  { %12 = vsyncpa [#allocation3], 0  ;;  %s2669_s0 = inlined_call_operand.vmem [shape: bf16[2,1024], index: 0, kind: input, shape index: {}]   ;;  %s2670_s1 = inlined_call_operand.hbm [shape: bf16[1024,256], index: 1, kind: input, shape index: {}]   ;;  %s2671_s2 = inlined_call_operand.vmem [shape: f32[1,256], index: 2, kind: input, shape index: {}]   ;;  %s2672_s3 = inlined_call_operand.hbm [shape: bf16[2,256,256], index: 3, kind: input, shape index: {}]   ;;  %s2673_s4 = inlined_call_operand.vmem [shape: f32[2,1,256], index: 4, kind: input, shape index: {}]   ;;  %s2674_s5 = inlined_call_operand.vmem [shape: bf16[256,256], index: 5, kind: input, shape index: {}]   ;;  %s2675_s6 = inlined_call_operand.vmem [shape: f32[1,256], index: 6, kind: input, shape index: {}]   ;;  %s2676_s7 = inlined_call_operand.vmem [shape: f32[2,256], index: 7, kind: output, shape index: {}]  }
   0x1   :  { %13 = vsyncpa [#allocation5], 0  ;;  %s2454_s24 = smov [#allocation2]   ;;  %s2406_s28 = scalar_lea.hbm %s2670_s1, 16384 }
   0x2   :  { %s21_s25 = sshll.u32 %s2454_s24, 4  ;;  %p2407_p0 = scmp.ne.s32.totalorder %s2670_s1, %s2406_s28  ;;  %s22_s25 = int_to_ptr.vmem [resolvable:$true] %s21_s25 }
   0x3   :  { %p2410_p1 = scmp.lt.u32.totalorder %s2406_s28, %s2670_s1 }
   0x5   :  { %p2412_p2 = pnand %p2410_p1, %p2407_p0 }
   0x7   :  { %2415 = shalt.err (!%p2412_p2)
}
   0x8   :  { %s2416_s10 = scalar_lea.vmem %s22_s25, 16384  ;;  %p2421_p4 = scmp.lt.s32.totalorder %s22_s25, %s22_s25 }
   0x9   :  { %p2417_p3 = scmp.ne.s32.totalorder %s22_s25, %s2416_s10  ;;  %p2422_p5 = scmp.lt.s32.totalorder %s2416_s10, %s2416_s10 }
   0xb   :  { %p2423_p6 = por %p2422_p5, %p2421_p4 }
   0xd   :  { %p2424_p7 = pnand %p2423_p6, %p2417_p3 }
   0xf   :  { %2427 = shalt.err (!%p2424_p7)
}
  0x10   :  { %s2455_s11 = smov 128   ;;  %s2456_s12 = smov 8  }
  0x11   :  { %27 = dma.hbm_to_vmem [thread:$0]  %s2670_s1, 16384, %s22_s25, [#allocation3], %s2455_s11, %s2455_s11, %s2456_s12  }
  0x12   :  { %s2457_s15 = smov [#allocation4]   ;;  %s2428_s19 = scalar_lea.hbm %s2672_s3, 8192 }
  0x13   :  { %s35_s16 = sshll.u32 %s2457_s15, 4  ;;  %p2429_p8 = scmp.ne.s32.totalorder %s2672_s3, %s2428_s19  ;;  %s36_s16 = int_to_ptr.vmem [resolvable:$true] %s35_s16 }
  0x14   :  { %p2432_p9 = scmp.lt.u32.totalorder %s2428_s19, %s2672_s3 }
  0x16   :  { %p2434_p10 = pnand %p2432_p9, %p2429_p8 }
  0x18   :  { %2437 = shalt.err (!%p2434_p10)
}
  0x19   :  { %s2438_s24 = scalar_lea.vmem %s36_s16, 8192  ;;  %p2443_p12 = scmp.lt.s32.totalorder %s36_s16, %s36_s16 }
  0x1a   :  { %p2439_p11 = scmp.ne.s32.totalorder %s36_s16, %s2438_s24  ;;  %p2444_p13 = scmp.lt.s32.totalorder %s2438_s24, %s2438_s24 }
  0x1c   :  { %p2445_p0 = por %p2444_p13, %p2443_p12 }
  0x1e   :  { %p2446_p1 = pnand %p2445_p0, %p2439_p11 }
  0x20   :  { %2449 = shalt.err (!%p2446_p1)
}
  0x21   :  { %41 = dma.hbm_to_vmem [thread:$0]  %s2672_s3, 8192, %s36_s16, [#allocation5], %s2455_s11, %s2455_s11, %s2456_s12  }
  0x22   :  { %2450 = dma.done.wait [#allocation3], 16384  }
  0x23   :  { %2451 = vsyncadd [#allocation3], 4294950912 }
  0x24   :  { %2452 = dma.done.wait [#allocation5], 8192  }
  0x25   :  { %2453 = vsyncadd [#allocation5], 4294959104  ;;  %v2069_v0 = vld [vmem:[#allocation2 + $0x4] ss:$8 sps:$4 sm:$0xff]   ;;  %v2071_v1 = vld [vmem:[#allocation2] ss:$8 sps:$4 sm:$0xff]   ;;  %v185_v7 = vlaneseq }
  0x26   :  { %893 = vmatprep.subr.bf16.mxu0 %v2069_v0  ;;  %v2072_v2 = vld [vmem:[#allocation2 + $0x14] ss:$8 sps:$4 sm:$0xff]   ;;  %v2074_v3 = vld [vmem:[#allocation2 + $0x10] ss:$8 sps:$4 sm:$0xff]   ;;  %v2075_v4 = vld [vmem:[#allocation2 + $0x24] ss:$8 sps:$4 sm:$0xff]  }
  0x27   :  { %894 = vmatpush1.bf16.msra.mxu0 %v2071_v1  ;;  %v2077_v5 = vld [vmem:[#allocation2 + $0x20] ss:$8 sps:$4 sm:$0xff]   ;;  %v2078_v6 = vld [vmem:[#allocation2 + $0x34] ss:$8 sps:$4 sm:$0xff]   ;;  %v2458_v8 = vmov 1966171168  }
  0x28   :  { %895 = vmatprep.subr.bf16.mxu0 %v2072_v2  ;;  %v198_v9 = vunpack.c.l.s4 %v2458_v8  ;;  %v2080_v10 = vld [vmem:[#allocation2 + $0x30] ss:$8 sps:$4 sm:$0xff]   ;;  %v2081_v11 = vld [vmem:[#allocation2 + $0x44] ss:$8 sps:$4 sm:$0xff]   ;;  %v2523_v12 = vshrl.u32 %v185_v7, 7 }
  0x29   :  { %v2083_v14 = vld [vmem:[#allocation2 + $0x40] ss:$8 sps:$4 sm:$0xff]   ;;  %v2084_v15 = vld [vmem:[#allocation2 + $0x54] ss:$8 sps:$4 sm:$0xff]   ;;  %v2086_v17 = vld [vmem:[#allocation2 + $0x50] ss:$8 sps:$4 sm:$0xff]  }
  0x2a   :  { %v199_v13 = vunpack.c.0.s8 %v198_v9  ;;  %v2087_v18 = vld [vmem:[#allocation2 + $0x64] ss:$8 sps:$4 sm:$0xff]   ;;  %v2089_v21 = vld [vmem:[#allocation2 + $0x60] ss:$8 sps:$4 sm:$0xff]   ;;  %v2090_v22 = vld [vmem:[#allocation2 + $0x74] ss:$8 sps:$4 sm:$0xff]  }
  0x2b   :  { %896 = vmatpush1.bf16.msra.mxu0 %v2074_v3  ;;  %v54_v19 = vld [vmem:[%s2669_s0] sm:$0xff]  ;;  %v2092_v25 = vld [vmem:[#allocation2 + $0x70] ss:$8 sps:$4 sm:$0xff]   ;;  %v2096_v28 = vld [vmem:[#allocation2 + $0x94] ss:$8 sps:$4 sm:$0xff]  }
  0x2c   :  { %897 = vmatprep.subr.bf16.mxu0 %v2075_v4  ;;  %v202_v16 = vsub.s32 %v199_v13, %v2523_v12  ;;  %v2093_v26 = vld [vmem:[#allocation2 + $0x84] ss:$8 sps:$4 sm:$0xff]   ;;  %v2095_v27 = vld [vmem:[#allocation2 + $0x80] ss:$8 sps:$4 sm:$0xff]   ;;  %v2098_v29 = vld [vmem:[#allocation2 + $0x90] ss:$8 sps:$4 sm:$0xff]   ;;  %v196_v41 = vcombine.high %v54_v19, %v54_v19 }
  0x2d   :  { %v2099_v30 = vld [vmem:[#allocation2 + $0xa4] ss:$8 sps:$4 sm:$0xff]   ;;  %v2101_v31 = vld [vmem:[#allocation2 + $0xa0] ss:$8 sps:$4 sm:$0xff]   ;;  %v2102_v32 = vld [vmem:[#allocation2 + $0xb4] ss:$8 sps:$4 sm:$0xff]  }
  0x2e   :  { %v203_v20 = vrot.slane %v54_v19, %v202_v16  ;;  %v2104_v33 = vld [vmem:[#allocation2 + $0xb0] ss:$8 sps:$4 sm:$0xff]   ;;  %v2105_v34 = vld [vmem:[#allocation2 + $0xc4] ss:$8 sps:$4 sm:$0xff]   ;;  %v2107_v35 = vld [vmem:[#allocation2 + $0xc0] ss:$8 sps:$4 sm:$0xff]   ;;  %v210_v44 = vrot.slane %v196_v41, %v202_v16 }
  0x2f   :  { %898 = vmatpush1.bf16.msra.mxu0 %v2077_v5  ;;  %v2108_v36 = vld [vmem:[#allocation2 + $0xd4] ss:$8 sps:$4 sm:$0xff]   ;;  %v2110_v37 = vld [vmem:[#allocation2 + $0xd0] ss:$8 sps:$4 sm:$0xff]   ;;  %v2111_v38 = vld [vmem:[#allocation2 + $0xe4] ss:$8 sps:$4 sm:$0xff]  }
  0x30   :  { %899 = vmatprep.subr.bf16.mxu0 %v2078_v6  ;;  %v211_v23 = vcombine.high %v203_v20, %v203_v20  ;;  %v2113_v39 = vld [vmem:[#allocation2 + $0xe0] ss:$8 sps:$4 sm:$0xff]   ;;  %v2114_v40 = vld [vmem:[#allocation2 + $0xf4] ss:$8 sps:$4 sm:$0xff]   ;;  %v2116_v42 = vld [vmem:[#allocation2 + $0xf0] ss:$8 sps:$4 sm:$0xff]   ;;  %v2529_v45 = vrot.slane %v203_v20, %v202_v16  ;;  %v212_v46 = vcombine.high %v210_v44, %v210_v44  ;;  %v2533_v51 = vrot.slane %v210_v44, %v202_v16 }
  0x31   :  { %v2120_v43 = vld [vmem:[#allocation2 + $0x104] ss:$8 sps:$4 sm:$0xff]   ;;  %v2118_v48 = vld [vmem:[#allocation2 + $0x100] ss:$8 sps:$4 sm:$0xff]   ;;  %v2123_v49 = vld [vmem:[#allocation2 + $0x114] ss:$8 sps:$4 sm:$0xff]  }
  0x32   :  { %v233_v24 = vrot.slane %v211_v23, %v202_v16  ;;  %v2531_v50 = vrot.slane %v212_v46, %v202_v16  ;;  %v2121_v52 = vld [vmem:[#allocation2 + $0x110] ss:$8 sps:$4 sm:$0xff]   ;;  %v2126_v53 = vld [vmem:[#allocation2 + $0x124] ss:$8 sps:$4 sm:$0xff]   ;;  %v2124_v54 = vld [vmem:[#allocation2 + $0x120] ss:$8 sps:$4 sm:$0xff]   ;;  %v241_v19 = vcombine.high %v2529_v45, %v2529_v45 }
  0x33   :  { %900 = vmatpush1.bf16.msra.mxu0 %v2080_v10  ;;  %v2129_v55 = vld [vmem:[#allocation2 + $0x134] ss:$8 sps:$4 sm:$0xff]   ;;  %v2127_v56 = vld [vmem:[#allocation2 + $0x130] ss:$8 sps:$4 sm:$0xff]   ;;  %v2132_v57 = vld [vmem:[#allocation2 + $0x144] ss:$8 sps:$4 sm:$0xff]  }
  0x34   :  { %901 = vmatprep.subr.bf16.mxu0 %v2081_v11  ;;  %925 = vmatprep.mubr.bf16.mxu0 %v233_v24  ;;  %v243_v47 = vcombine.high %v233_v24, %v233_v24  ;;  %v2130_v58 = vld [vmem:[#allocation2 + $0x140] ss:$8 sps:$4 sm:$0xff]   ;;  %v2135_v59 = vld [vmem:[#allocation2 + $0x154] ss:$8 sps:$4 sm:$0xff]   ;;  %v2133_v60 = vld [vmem:[#allocation2 + $0x150] ss:$8 sps:$4 sm:$0xff]  }
  0x35   :  { %v2138_v61 = vld [vmem:[#allocation2 + $0x164] ss:$8 sps:$4 sm:$0xff]   ;;  %v2136_v62 = vld [vmem:[#allocation2 + $0x160] ss:$8 sps:$4 sm:$0xff]   ;;  %v2141_v63 = vld [vmem:[#allocation2 + $0x174] ss:$8 sps:$4 sm:$0xff]  }
  0x36   :  { %v2139_v0 = vld [vmem:[#allocation2 + $0x170] ss:$8 sps:$4 sm:$0xff]   ;;  %v2144_v1 = vld [vmem:[#allocation2 + $0x184] ss:$8 sps:$4 sm:$0xff]   ;;  %v2142_v2 = vld [vmem:[#allocation2 + $0x180] ss:$8 sps:$4 sm:$0xff]  }
  0x37   :  { %902 = vmatpush1.bf16.msra.mxu0 %v2083_v14  ;;  %v2147_v3 = vld [vmem:[#allocation2 + $0x194] ss:$8 sps:$4 sm:$0xff]   ;;  %v2145_v4 = vld [vmem:[#allocation2 + $0x190] ss:$8 sps:$4 sm:$0xff]   ;;  %v2150_v5 = vld [vmem:[#allocation2 + $0x1a4] ss:$8 sps:$4 sm:$0xff]  }
  0x38   :  { %903 = vmatprep.subr.bf16.mxu0 %v2084_v15  ;;  %v2148_v6 = vld [vmem:[#allocation2 + $0x1a0] ss:$8 sps:$4 sm:$0xff]   ;;  %v2153_v7 = vld [vmem:[#allocation2 + $0x1b4] ss:$8 sps:$4 sm:$0xff]   ;;  %v2151_v8 = vld [vmem:[#allocation2 + $0x1b0] ss:$8 sps:$4 sm:$0xff]  }
  0x39   :  { %v2156_v9 = vld [vmem:[#allocation2 + $0x1c4] ss:$8 sps:$4 sm:$0xff]   ;;  %v2154_v10 = vld [vmem:[#allocation2 + $0x1c0] ss:$8 sps:$4 sm:$0xff]   ;;  %v2159_v11 = vld [vmem:[#allocation2 + $0x1d4] ss:$8 sps:$4 sm:$0xff]  }
  0x3a   :  { %v2157_v13 = vld [vmem:[#allocation2 + $0x1d0] ss:$8 sps:$4 sm:$0xff]   ;;  %v2162_v14 = vld [vmem:[#allocation2 + $0x1e4] ss:$8 sps:$4 sm:$0xff]   ;;  %v2160_v15 = vld [vmem:[#allocation2 + $0x1e0] ss:$8 sps:$4 sm:$0xff]  }
  0x3b   :  { %904 = vmatpush1.bf16.msra.mxu0 %v2086_v17  ;;  %v2165_v16 = vld [vmem:[#allocation2 + $0x1f4] ss:$8 sps:$4 sm:$0xff]   ;;  %v2163_v17 = vld [vmem:[#allocation2 + $0x1f0] ss:$8 sps:$4 sm:$0xff]   ;;  %v2166_v20 = vld [vmem:[#allocation2 + $0x200] ss:$8 sps:$4 sm:$0xff]  }
  0x3c   :  { %905 = vmatprep.subr.bf16.mxu0 %v2087_v18  ;;  %v2168_v18 = vld [vmem:[#allocation2 + $0x204] ss:$8 sps:$4 sm:$0xff]   ;;  %v2264_v23 = vld [vmem:[#allocation4] ss:$8 sps:$4 sm:$0xff]   ;;  %v2265_v24 = vld [vmem:[#allocation4 + $0x14] ss:$8 sps:$4 sm:$0xff]  }
  0x3d   :  { %v2181_v41 = vld [vmem:[#allocation2 + $0x250] ss:$8 sps:$4 sm:$0xff]   ;;  %v2280_v44 = vld [vmem:[#allocation4 + $0x64] ss:$8 sps:$4 sm:$0xff]   ;;  %v2189_v46 = vld [vmem:[#allocation2 + $0x274] ss:$8 sps:$4 sm:$0xff]  }
  0x3f   :  { %906 = vmatpush1.bf16.msra.mxu0 %v2089_v21  ;;  %v2171_v21 = vld [vmem:[#allocation2 + $0x214] ss:$8 sps:$4 sm:$0xff]  }
  0x40   :  { %907 = vmatprep.subr.bf16.mxu0 %v2090_v22  ;;  %v2262_v22 = vld [vmem:[#allocation4 + $0x4] ss:$8 sps:$4 sm:$0xff]  }
  0x41   :  { %1265 = vmatprep.subr.bf16.mxu1 %v2262_v22  ;;  %v2217_v22 = vld [vmem:[#allocation2 + $0x310] ss:$8 sps:$4 sm:$0xff]  }
  0x42   :  { %1266 = vmatpush1.bf16.msra.mxu1 %v2264_v23  ;;  %v2222_v23 = vld [vmem:[#allocation2 + $0x324] ss:$8 sps:$4 sm:$0xff]  }
  0x43   :  { %908 = vmatpush1.bf16.msra.mxu0 %v2092_v25  ;;  %v2169_v25 = vld [vmem:[#allocation2 + $0x210] ss:$8 sps:$4 sm:$0xff]   ;;  %1267 = vmatprep.subr.bf16.mxu1 %v2265_v24  ;;  %v2220_v24 = vld [vmem:[#allocation2 + $0x320] ss:$8 sps:$4 sm:$0xff]  }
  0x44   :  { %909 = vmatprep.subr.bf16.mxu0 %v2093_v26  ;;  %v2174_v26 = vld [vmem:[#allocation2 + $0x224] ss:$8 sps:$4 sm:$0xff]  }
  0x47   :  { %910 = vmatpush1.bf16.msra.mxu0 %v2095_v27  ;;  %v2267_v27 = vld [vmem:[#allocation4 + $0x10] ss:$8 sps:$4 sm:$0xff]  }
  0x48   :  { %911 = vmatprep.subr.bf16.mxu0 %v2096_v28  ;;  %v2268_v28 = vld [vmem:[#allocation4 + $0x24] ss:$8 sps:$4 sm:$0xff]   ;;  %1268 = vmatpush1.bf16.msra.mxu1 %v2267_v27 }
  0x49   :  { %1269 = vmatprep.subr.bf16.mxu1 %v2268_v28  ;;  %v2228_v27 = vld [vmem:[#allocation2 + $0x344] ss:$8 sps:$4 sm:$0xff]   ;;  %v2226_v28 = vld [vmem:[#allocation2 + $0x340] ss:$8 sps:$4 sm:$0xff]  }
  0x4b   :  { %912 = vmatpush1.bf16.msra.mxu0 %v2098_v29  ;;  %v2172_v29 = vld [vmem:[#allocation2 + $0x220] ss:$8 sps:$4 sm:$0xff]  }
  0x4c   :  { %913 = vmatprep.subr.bf16.mxu0 %v2099_v30  ;;  %v2177_v30 = vld [vmem:[#allocation2 + $0x234] ss:$8 sps:$4 sm:$0xff]  }
  0x4f   :  { %914 = vmatpush1.bf16.msra.mxu0 %v2101_v31  ;;  %v2270_v31 = vld [vmem:[#allocation4 + $0x20] ss:$8 sps:$4 sm:$0xff]  }
  0x50   :  { %915 = vmatprep.subr.bf16.mxu0 %v2102_v32  ;;  %v2271_v32 = vld [vmem:[#allocation4 + $0x34] ss:$8 sps:$4 sm:$0xff]   ;;  %1270 = vmatpush1.bf16.msra.mxu1 %v2270_v31  ;;  %v2232_v31 = vld [vmem:[#allocation2 + $0x360] ss:$8 sps:$4 sm:$0xff]  }
  0x51   :  { %1271 = vmatprep.subr.bf16.mxu1 %v2271_v32  ;;  %v2237_v32 = vld [vmem:[#allocation2 + $0x374] ss:$8 sps:$4 sm:$0xff]  }
  0x53   :  { %916 = vmatpush1.bf16.msra.mxu0 %v2104_v33  ;;  %v2175_v33 = vld [vmem:[#allocation2 + $0x230] ss:$8 sps:$4 sm:$0xff]  }
  0x54   :  { %917 = vmatprep.subr.bf16.mxu0 %v2105_v34  ;;  %v2180_v34 = vld [vmem:[#allocation2 + $0x244] ss:$8 sps:$4 sm:$0xff]  }
  0x57   :  { %918 = vmatpush1.bf16.msra.mxu0 %v2107_v35  ;;  %v2273_v35 = vld [vmem:[#allocation4 + $0x30] ss:$8 sps:$4 sm:$0xff]  }
  0x58   :  { %919 = vmatprep.subr.bf16.mxu0 %v2108_v36  ;;  %v2274_v36 = vld [vmem:[#allocation4 + $0x44] ss:$8 sps:$4 sm:$0xff]   ;;  %1272 = vmatpush1.bf16.msra.mxu1 %v2273_v35  ;;  %v2238_v35 = vld [vmem:[#allocation2 + $0x380] ss:$8 sps:$4 sm:$0xff]  }
  0x59   :  { %1273 = vmatprep.subr.bf16.mxu1 %v2274_v36  ;;  %v2243_v36 = vld [vmem:[#allocation2 + $0x394] ss:$8 sps:$4 sm:$0xff]  }
  0x5b   :  { %920 = vmatpush1.bf16.msra.mxu0 %v2110_v37  ;;  %v2178_v37 = vld [vmem:[#allocation2 + $0x240] ss:$8 sps:$4 sm:$0xff]  }
  0x5c   :  { %921 = vmatprep.subr.bf16.mxu0 %v2111_v38  ;;  %v2183_v38 = vld [vmem:[#allocation2 + $0x254] ss:$8 sps:$4 sm:$0xff]  }
  0x5f   :  { %922 = vmatpush1.bf16.msra.mxu0 %v2113_v39  ;;  %v2276_v39 = vld [vmem:[#allocation4 + $0x40] ss:$8 sps:$4 sm:$0xff]  }
  0x60   :  { %923 = vmatprep.subr.bf16.mxu0 %v2114_v40  ;;  %v2277_v40 = vld [vmem:[#allocation4 + $0x54] ss:$8 sps:$4 sm:$0xff]   ;;  %1274 = vmatpush1.bf16.msra.mxu1 %v2276_v39  ;;  %v2244_v39 = vld [vmem:[#allocation2 + $0x3a0] ss:$8 sps:$4 sm:$0xff]  }
  0x61   :  { %1275 = vmatprep.subr.bf16.mxu1 %v2277_v40  ;;  %v2249_v40 = vld [vmem:[#allocation2 + $0x3b4] ss:$8 sps:$4 sm:$0xff]  }
  0x63   :  { %924 = vmatpush1.bf16.msra.mxu0 %v2116_v42  ;;  %v2186_v42 = vld [vmem:[#allocation2 + $0x264] ss:$8 sps:$4 sm:$0xff]  }
  0x64   :  { %934 = vmatprep.subr.bf16.mxu0 %v2120_v43  ;;  %v2279_v43 = vld [vmem:[#allocation4 + $0x50] ss:$8 sps:$4 sm:$0xff]  }
  0x65   :  { %1276 = vmatpush1.bf16.msra.mxu1 %v2279_v43  ;;  %v2250_v43 = vld [vmem:[#allocation2 + $0x3c0] ss:$8 sps:$4 sm:$0xff]  }
  0x66   :  { %926 = vmatmul.mubr.bf16.vlgmr.msra.gmra.mrb[0].mxu0 %v2529_v45  ;;  %v2184_v45 = vld [vmem:[#allocation2 + $0x260] ss:$8 sps:$4 sm:$0xff]   ;;  %1277 = vmatprep.subr.bf16.mxu1 %v2280_v44  ;;  %v2255_v44 = vld [vmem:[#allocation2 + $0x3d4] ss:$8 sps:$4 sm:$0xff]  }
  0x67   :  { %935 = vmatpush1.bf16.msra.mxu0 %v2118_v48  ;;  %966 = vmatprep.mubr.bf16.mxu0 %v243_v47  ;;  %v2282_v47 = vld [vmem:[#allocation4 + $0x60] ss:$8 sps:$4 sm:$0xff]   ;;  %v2283_v48 = vld [vmem:[#allocation4 + $0x74] ss:$8 sps:$4 sm:$0xff]  }
  0x68   :  { %936 = vmatprep.subr.bf16.mxu0 %v2123_v49  ;;  %v2187_v49 = vld [vmem:[#allocation2 + $0x270] ss:$8 sps:$4 sm:$0xff]  }
  0x69   :  { %1278 = vmatpush1.bf16.msra.mxu1 %v2282_v47  ;;  %v2256_v47 = vld [vmem:[#allocation2 + $0x3e0] ss:$8 sps:$4 sm:$0xff]  }
  0x6a   :  { %1279 = vmatprep.subr.bf16.mxu1 %v2283_v48  ;;  %v2261_v48 = vld [vmem:[#allocation2 + $0x3f4] ss:$8 sps:$4 sm:$0xff]  }
  0x6b   :  { %937 = vmatpush1.bf16.msra.mxu0 %v2121_v52  ;;  %v2192_v52 = vld [vmem:[#allocation2 + $0x284] ss:$8 sps:$4 sm:$0xff]  }
  0x6c   :  { %938 = vmatprep.subr.bf16.mxu0 %v2126_v53  ;;  %v2285_v53 = vld [vmem:[#allocation4 + $0x70] ss:$8 sps:$4 sm:$0xff]  }
  0x6d   :  { %1280 = vmatpush1.bf16.msra.mxu1 %v2285_v53  ;;  %v2304_v53 = vld [vmem:[#allocation4 + $0xe4] ss:$8 sps:$4 sm:$0xff]  }
  0x6f   :  { %939 = vmatpush1.bf16.msra.mxu0 %v2124_v54  ;;  %v2286_v54 = vld [vmem:[#allocation4 + $0x84] ss:$8 sps:$4 sm:$0xff]  }
  0x70   :  { %940 = vmatprep.subr.bf16.mxu0 %v2129_v55  ;;  %v2190_v55 = vld [vmem:[#allocation2 + $0x280] ss:$8 sps:$4 sm:$0xff]   ;;  %1281 = vmatprep.subr.bf16.mxu1 %v2286_v54 }
  0x71   :  { %v2306_v54 = vld [vmem:[#allocation4 + $0xe0] ss:$8 sps:$4 sm:$0xff]  }
  0x73   :  { %941 = vmatpush1.bf16.msra.mxu0 %v2127_v56  ;;  %v2195_v56 = vld [vmem:[#allocation2 + $0x294] ss:$8 sps:$4 sm:$0xff]  }
  0x74   :  { %942 = vmatprep.subr.bf16.mxu0 %v2132_v57  ;;  %v2288_v57 = vld [vmem:[#allocation4 + $0x80] ss:$8 sps:$4 sm:$0xff]  }
  0x75   :  { %1282 = vmatpush1.bf16.msra.mxu1 %v2288_v57  ;;  %v2312_v57 = vld [vmem:[#allocation4 + $0x104] ss:$8 sps:$4 sm:$0xff]  }
  0x77   :  { %943 = vmatpush1.bf16.msra.mxu0 %v2130_v58  ;;  %v2289_v58 = vld [vmem:[#allocation4 + $0x94] ss:$8 sps:$4 sm:$0xff]  }
  0x78   :  { %944 = vmatprep.subr.bf16.mxu0 %v2135_v59  ;;  %v2193_v59 = vld [vmem:[#allocation2 + $0x290] ss:$8 sps:$4 sm:$0xff]   ;;  %1283 = vmatprep.subr.bf16.mxu1 %v2289_v58  ;;  %v2545_v58 = vsub.s32 0, %v2523_v12 }
  0x7b   :  { %945 = vmatpush1.bf16.msra.mxu0 %v2133_v60  ;;  %v2198_v60 = vld [vmem:[#allocation2 + $0x2a4] ss:$8 sps:$4 sm:$0xff]  }
  0x7c   :  { %946 = vmatprep.subr.bf16.mxu0 %v2138_v61  ;;  %v2291_v61 = vld [vmem:[#allocation4 + $0x90] ss:$8 sps:$4 sm:$0xff]  }
  0x7d   :  { %1284 = vmatpush1.bf16.msra.mxu1 %v2291_v61 }
  0x7f   :  { %947 = vmatpush1.bf16.msra.mxu0 %v2136_v62  ;;  %v2292_v62 = vld [vmem:[#allocation4 + $0xa4] ss:$8 sps:$4 sm:$0xff]  }
  0x80   :  { %948 = vmatprep.subr.bf16.mxu0 %v2141_v63  ;;  %v2196_v63 = vld [vmem:[#allocation2 + $0x2a0] ss:$8 sps:$4 sm:$0xff]   ;;  %1285 = vmatprep.subr.bf16.mxu1 %v2292_v62 }
  0x83   :  { %949 = vmatpush1.bf16.msra.mxu0 %v2139_v0  ;;  %v2201_v0 = vld [vmem:[#allocation2 + $0x2b4] ss:$8 sps:$4 sm:$0xff]  }
  0x84   :  { %950 = vmatprep.subr.bf16.mxu0 %v2144_v1  ;;  %v2294_v1 = vld [vmem:[#allocation4 + $0xa0] ss:$8 sps:$4 sm:$0xff]  }
  0x85   :  { %1286 = vmatpush1.bf16.msra.mxu1 %v2294_v1 }
  0x87   :  { %951 = vmatpush1.bf16.msra.mxu0 %v2142_v2  ;;  %v2295_v2 = vld [vmem:[#allocation4 + $0xb4] ss:$8 sps:$4 sm:$0xff]  }
  0x88   :  { %952 = vmatprep.subr.bf16.mxu0 %v2147_v3  ;;  %v2199_v3 = vld [vmem:[#allocation2 + $0x2b0] ss:$8 sps:$4 sm:$0xff]   ;;  %1287 = vmatprep.subr.bf16.mxu1 %v2295_v2 }
  0x8b   :  { %953 = vmatpush1.bf16.msra.mxu0 %v2145_v4  ;;  %v2204_v4 = vld [vmem:[#allocation2 + $0x2c4] ss:$8 sps:$4 sm:$0xff]  }
  0x8c   :  { %954 = vmatprep.subr.bf16.mxu0 %v2150_v5  ;;  %v2297_v5 = vld [vmem:[#allocation4 + $0xb0] ss:$8 sps:$4 sm:$0xff]  }
  0x8d   :  { %1288 = vmatpush1.bf16.msra.mxu1 %v2297_v5 }
  0x8f   :  { %955 = vmatpush1.bf16.msra.mxu0 %v2148_v6  ;;  %v2298_v6 = vld [vmem:[#allocation4 + $0xc4] ss:$8 sps:$4 sm:$0xff]  }
  0x90   :  { %956 = vmatprep.subr.bf16.mxu0 %v2153_v7  ;;  %v2202_v7 = vld [vmem:[#allocation2 + $0x2c0] ss:$8 sps:$4 sm:$0xff]   ;;  %1289 = vmatprep.subr.bf16.mxu1 %v2298_v6 }
  0x93   :  { %957 = vmatpush1.bf16.msra.mxu0 %v2151_v8  ;;  %v2207_v8 = vld [vmem:[#allocation2 + $0x2d4] ss:$8 sps:$4 sm:$0xff]  }
  0x94   :  { %958 = vmatprep.subr.bf16.mxu0 %v2156_v9  ;;  %v2300_v9 = vld [vmem:[#allocation4 + $0xc0] ss:$8 sps:$4 sm:$0xff]  }
  0x95   :  { %1290 = vmatpush1.bf16.msra.mxu1 %v2300_v9  ;;  %v2315_v9 = vld [vmem:[#allocation4 + $0x114] ss:$8 sps:$4 sm:$0xff]  }
  0x97   :  { %959 = vmatpush1.bf16.msra.mxu0 %v2154_v10  ;;  %v2301_v10 = vld [vmem:[#allocation4 + $0xd4] ss:$8 sps:$4 sm:$0xff]  }
  0x98   :  { %960 = vmatprep.subr.bf16.mxu0 %v2159_v11  ;;  %v2205_v11 = vld [vmem:[#allocation2 + $0x2d0] ss:$8 sps:$4 sm:$0xff]   ;;  %1291 = vmatprep.subr.bf16.mxu1 %v2301_v10  ;;  %v2318_v10 = vld [vmem:[#allocation4 + $0x124] ss:$8 sps:$4 sm:$0xff]  }
  0x9b   :  { %961 = vmatpush1.bf16.msra.mxu0 %v2157_v13  ;;  %v2210_v13 = vld [vmem:[#allocation2 + $0x2e4] ss:$8 sps:$4 sm:$0xff]  }
  0x9c   :  { %962 = vmatprep.subr.bf16.mxu0 %v2162_v14  ;;  %v2303_v14 = vld [vmem:[#allocation4 + $0xd0] ss:$8 sps:$4 sm:$0xff]  }
  0x9d   :  { %1292 = vmatpush1.bf16.msra.mxu1 %v2303_v14  ;;  %v2319_v14 = vld [vmem:[#allocation4 + $0x130] ss:$8 sps:$4 sm:$0xff]  }
  0x9e   :  { %1293 = vmatprep.subr.bf16.mxu1 %v2304_v53  ;;  %v2358_v53 = vld [vmem:[%s2674_s5] ss:$8 sps:$4 sm:$0xff]  }
  0x9f   :  { %963 = vmatpush1.bf16.msra.mxu0 %v2160_v15  ;;  %v2208_v15 = vld [vmem:[#allocation2 + $0x2e0] ss:$8 sps:$4 sm:$0xff]  }
  0xa0   :  { %964 = vmatprep.subr.bf16.mxu0 %v2165_v16  ;;  %v2213_v16 = vld [vmem:[#allocation2 + $0x2f4] ss:$8 sps:$4 sm:$0xff]  }
  0xa1   :  { %1294 = vmatpush1.bf16.msra.mxu1 %v2306_v54 }
  0xa3   :  { %965 = vmatpush1.bf16.msra.mxu0 %v2163_v17  ;;  %v2211_v17 = vld [vmem:[#allocation2 + $0x2f0] ss:$8 sps:$4 sm:$0xff]  }
  0xa4   :  { %975 = vmatprep.subr.bf16.mxu0 %v2168_v18  ;;  %v2216_v18 = vld [vmem:[#allocation2 + $0x304] ss:$8 sps:$4 sm:$0xff]  }
  0xa6   :  { %967 = vmatmul.mubr.bf16.vlgmr.msra.gmra.mrb[0].mxu0 %v241_v19  ;;  %v2214_v19 = vld [vmem:[#allocation2 + $0x300] ss:$8 sps:$4 sm:$0xff]  }
  0xa7   :  { %976 = vmatpush1.bf16.msra.mxu0 %v2166_v20  ;;  %1007 = vmatprep.mubr.bf16.mxu0 %v2531_v50  ;;  %v244_v20 = vcombine.high %v2531_v50, %v2531_v50  ;;  %v2231_v50 = vld [vmem:[#allocation2 + $0x354] ss:$8 sps:$4 sm:$0xff]  }
  0xa8   :  { %977 = vmatprep.subr.bf16.mxu0 %v2171_v21  ;;  %v2219_v21 = vld [vmem:[#allocation2 + $0x314] ss:$8 sps:$4 sm:$0xff]  }
  0xab   :  { %978 = vmatpush1.bf16.msra.mxu0 %v2169_v25  ;;  %v2225_v25 = vld [vmem:[#allocation2 + $0x334] ss:$8 sps:$4 sm:$0xff]  }
  0xac   :  { %979 = vmatprep.subr.bf16.mxu0 %v2174_v26  ;;  %v2223_v26 = vld [vmem:[#allocation2 + $0x330] ss:$8 sps:$4 sm:$0xff]  }
  0xaf   :  { %980 = vmatpush1.bf16.msra.mxu0 %v2172_v29  ;;  %v2229_v29 = vld [vmem:[#allocation2 + $0x350] ss:$8 sps:$4 sm:$0xff]  }
  0xb0   :  { %981 = vmatprep.subr.bf16.mxu0 %v2177_v30  ;;  %v2234_v30 = vld [vmem:[#allocation2 + $0x364] ss:$8 sps:$4 sm:$0xff]  }
  0xb3   :  { %982 = vmatpush1.bf16.msra.mxu0 %v2175_v33  ;;  %v2235_v33 = vld [vmem:[#allocation2 + $0x370] ss:$8 sps:$4 sm:$0xff]  }
  0xb4   :  { %983 = vmatprep.subr.bf16.mxu0 %v2180_v34  ;;  %v2240_v34 = vld [vmem:[#allocation2 + $0x384] ss:$8 sps:$4 sm:$0xff]  }
  0xb7   :  { %984 = vmatpush1.bf16.msra.mxu0 %v2178_v37  ;;  %v2241_v37 = vld [vmem:[#allocation2 + $0x390] ss:$8 sps:$4 sm:$0xff]  }
  0xb8   :  { %985 = vmatprep.subr.bf16.mxu0 %v2183_v38  ;;  %v2246_v38 = vld [vmem:[#allocation2 + $0x3a4] ss:$8 sps:$4 sm:$0xff]  }
  0xbb   :  { %986 = vmatpush1.bf16.msra.mxu0 %v2181_v41  ;;  %v2247_v41 = vld [vmem:[#allocation2 + $0x3b0] ss:$8 sps:$4 sm:$0xff]  }
  0xbc   :  { %987 = vmatprep.subr.bf16.mxu0 %v2186_v42  ;;  %v2252_v42 = vld [vmem:[#allocation2 + $0x3c4] ss:$8 sps:$4 sm:$0xff]  }
  0xbf   :  { %988 = vmatpush1.bf16.msra.mxu0 %v2184_v45  ;;  %v2253_v45 = vld [vmem:[#allocation2 + $0x3d0] ss:$8 sps:$4 sm:$0xff]  }
  0xc0   :  { %989 = vmatprep.subr.bf16.mxu0 %v2189_v46  ;;  %v2258_v46 = vld [vmem:[#allocation2 + $0x3e4] ss:$8 sps:$4 sm:$0xff]  }
  0xc3   :  { %990 = vmatpush1.bf16.msra.mxu0 %v2187_v49  ;;  %v2259_v49 = vld [vmem:[#allocation2 + $0x3f0] ss:$8 sps:$4 sm:$0xff]  }
  0xc4   :  { %991 = vmatprep.subr.bf16.mxu0 %v2192_v52  ;;  %v242_v52 = vcombine.high %v2533_v51, %v2533_v51 }
  0xc7   :  { %992 = vmatpush1.bf16.msra.mxu0 %v2190_v55  ;;  %v2307_v55 = vld [vmem:[#allocation4 + $0xf4] ss:$8 sps:$4 sm:$0xff]  }
  0xc8   :  { %993 = vmatprep.subr.bf16.mxu0 %v2195_v56  ;;  %v2309_v56 = vld [vmem:[#allocation4 + $0xf0] ss:$8 sps:$4 sm:$0xff]   ;;  %1295 = vmatprep.subr.bf16.mxu1 %v2307_v55  ;;  %v2363_v55 = vld [vmem:[%s2674_s5 + $0x14] ss:$8 sps:$4 sm:$0xff]  }
  0xc9   :  { %1296 = vmatpush1.bf16.msra.mxu1 %v2309_v56  ;;  %v2361_v56 = vld [vmem:[%s2674_s5 + $0x10] ss:$8 sps:$4 sm:$0xff]  }
  0xca   :  { %1516 = vmatprep.subr.bf16.mxu1 %v2312_v57  ;;  %v2366_v57 = vld [vmem:[%s2674_s5 + $0x24] ss:$8 sps:$4 sm:$0xff]  }
  0xcb   :  { %994 = vmatpush1.bf16.msra.mxu0 %v2193_v59  ;;  %v183_v59 = vld [vmem:[%s2671_s2] sm:$0x3] }
  0xcc   :  { %995 = vmatprep.subr.bf16.mxu0 %v2198_v60  ;;  %v188_v60 = vrot.slane %v183_v59, %v2545_v58 }
  0xcf   :  { %996 = vmatpush1.bf16.msra.mxu0 %v2196_v63 }
  0xd0   :  { %997 = vmatprep.subr.bf16.mxu0 %v2201_v0 }
  0xd3   :  { %998 = vmatpush1.bf16.msra.mxu0 %v2199_v3 }
  0xd4   :  { %999 = vmatprep.subr.bf16.mxu0 %v2204_v4 }
  0xd7   :  { %1000 = vmatpush1.bf16.msra.mxu0 %v2202_v7  ;;  %v2310_v7 = vld [vmem:[#allocation4 + $0x100] ss:$8 sps:$4 sm:$0xff]  }
  0xd8   :  { %1001 = vmatprep.subr.bf16.mxu0 %v2207_v8 }
  0xdb   :  { %1002 = vmatpush1.bf16.msra.mxu0 %v2205_v11  ;;  %v2316_v11 = vld [vmem:[#allocation4 + $0x120] ss:$8 sps:$4 sm:$0xff]  }
  0xdc   :  { %1003 = vmatprep.subr.bf16.mxu0 %v2210_v13  ;;  %v2321_v13 = vld [vmem:[#allocation4 + $0x134] ss:$8 sps:$4 sm:$0xff]  }
  0xdf   :  { %1004 = vmatpush1.bf16.msra.mxu0 %v2208_v15  ;;  %v2324_v15 = vld [vmem:[#allocation4 + $0x144] ss:$8 sps:$4 sm:$0xff]  }
  0xe0   :  { %1005 = vmatprep.subr.bf16.mxu0 %v2213_v16  ;;  %v2322_v16 = vld [vmem:[#allocation4 + $0x140] ss:$8 sps:$4 sm:$0xff]  }
  0xe3   :  { %1006 = vmatpush1.bf16.msra.mxu0 %v2211_v17  ;;  %v2327_v17 = vld [vmem:[#allocation4 + $0x154] ss:$8 sps:$4 sm:$0xff]  }
  0xe4   :  { %1016 = vmatprep.subr.bf16.mxu0 %v2216_v18  ;;  %v2325_v18 = vld [vmem:[#allocation4 + $0x150] ss:$8 sps:$4 sm:$0xff]  }
  0xe6   :  { %1008 = vmatmul.mubr.bf16.vlgmr.msra.gmra.mrb[0].mxu0 %v2533_v51  ;;  %v2551_v51 = vsub.s32 1, %v2523_v12  ;;  %v2313_v12 = vld [vmem:[#allocation4 + $0x110] ss:$8 sps:$4 sm:$0xff]  }
  0xe7   :  { %1017 = vmatpush1.bf16.msra.mxu0 %v2214_v19  ;;  %1048 = vmatprep.mubr.bf16.mxu0 %v244_v20  ;;  %v2330_v19 = vld [vmem:[#allocation4 + $0x164] ss:$8 sps:$4 sm:$0xff]   ;;  %v2328_v20 = vld [vmem:[#allocation4 + $0x160] ss:$8 sps:$4 sm:$0xff]  }
  0xe8   :  { %1018 = vmatprep.subr.bf16.mxu0 %v2219_v21  ;;  %v192_v61 = vrot.slane %v183_v59, %v2551_v51  ;;  %v2333_v21 = vld [vmem:[#allocation4 + $0x174] ss:$8 sps:$4 sm:$0xff]   ;;  %v2364_v59 = vld [vmem:[%s2674_s5 + $0x20] ss:$8 sps:$4 sm:$0xff]  }
  0xeb   :  { %1019 = vmatpush1.bf16.msra.mxu0 %v2217_v22  ;;  %v2331_v22 = vld [vmem:[#allocation4 + $0x170] ss:$8 sps:$4 sm:$0xff]  }
  0xec   :  { %1020 = vmatprep.subr.bf16.mxu0 %v2222_v23  ;;  %v2336_v23 = vld [vmem:[#allocation4 + $0x184] ss:$8 sps:$4 sm:$0xff]  }
  0xef   :  { %1021 = vmatpush1.bf16.msra.mxu0 %v2220_v24  ;;  %v2334_v24 = vld [vmem:[#allocation4 + $0x180] ss:$8 sps:$4 sm:$0xff]  }
  0xf0   :  { %1022 = vmatprep.subr.bf16.mxu0 %v2225_v25  ;;  %v2339_v25 = vld [vmem:[#allocation4 + $0x194] ss:$8 sps:$4 sm:$0xff]  }
  0xf3   :  { %1023 = vmatpush1.bf16.msra.mxu0 %v2223_v26  ;;  %v2337_v26 = vld [vmem:[#allocation4 + $0x190] ss:$8 sps:$4 sm:$0xff]  }
  0xf4   :  { %1024 = vmatprep.subr.bf16.mxu0 %v2228_v27  ;;  %v2342_v27 = vld [vmem:[#allocation4 + $0x1a4] ss:$8 sps:$4 sm:$0xff]  }
  0xf7   :  { %1025 = vmatpush1.bf16.msra.mxu0 %v2226_v28  ;;  %v2340_v28 = vld [vmem:[#allocation4 + $0x1a0] ss:$8 sps:$4 sm:$0xff]  }
  0xf8   :  { %1026 = vmatprep.subr.bf16.mxu0 %v2231_v50  ;;  %v2345_v50 = vld [vmem:[#allocation4 + $0x1b4] ss:$8 sps:$4 sm:$0xff]  }
  0xfb   :  { %1027 = vmatpush1.bf16.msra.mxu0 %v2229_v29  ;;  %v2343_v29 = vld [vmem:[#allocation4 + $0x1b0] ss:$8 sps:$4 sm:$0xff]  }
  0xfc   :  { %1028 = vmatprep.subr.bf16.mxu0 %v2234_v30  ;;  %v2348_v30 = vld [vmem:[#allocation4 + $0x1c4] ss:$8 sps:$4 sm:$0xff]  }
  0xff   :  { %1029 = vmatpush1.bf16.msra.mxu0 %v2232_v31  ;;  %v2346_v31 = vld [vmem:[#allocation4 + $0x1c0] ss:$8 sps:$4 sm:$0xff]  }
 0x100   :  { %1030 = vmatprep.subr.bf16.mxu0 %v2237_v32  ;;  %v2351_v32 = vld [vmem:[#allocation4 + $0x1d4] ss:$8 sps:$4 sm:$0xff]  }
 0x103   :  { %1031 = vmatpush1.bf16.msra.mxu0 %v2235_v33  ;;  %v2349_v33 = vld [vmem:[#allocation4 + $0x1d0] ss:$8 sps:$4 sm:$0xff]  }
 0x104   :  { %1032 = vmatprep.subr.bf16.mxu0 %v2240_v34  ;;  %v2354_v34 = vld [vmem:[#allocation4 + $0x1e4] ss:$8 sps:$4 sm:$0xff]  }
 0x107   :  { %1033 = vmatpush1.bf16.msra.mxu0 %v2238_v35  ;;  %v2352_v35 = vld [vmem:[#allocation4 + $0x1e0] ss:$8 sps:$4 sm:$0xff]  }
 0x108   :  { %1034 = vmatprep.subr.bf16.mxu0 %v2243_v36  ;;  %v2357_v36 = vld [vmem:[#allocation4 + $0x1f4] ss:$8 sps:$4 sm:$0xff]  }
 0x10b   :  { %1035 = vmatpush1.bf16.msra.mxu0 %v2241_v37  ;;  %v2355_v37 = vld [vmem:[#allocation4 + $0x1f0] ss:$8 sps:$4 sm:$0xff]  }
 0x10c   :  { %1036 = vmatprep.subr.bf16.mxu0 %v2246_v38  ;;  %v2360_v38 = vld [vmem:[%s2674_s5 + $0x4] ss:$8 sps:$4 sm:$0xff]  }
 0x10f   :  { %1037 = vmatpush1.bf16.msra.mxu0 %v2244_v39  ;;  %v1093_v39 = vld [vmem:[%s2673_s4] sm:$0x3] }
 0x110   :  { %1038 = vmatprep.subr.bf16.mxu0 %v2249_v40  ;;  %v1098_v40 = vrot.slane %v1093_v39, %v2545_v58 }
 0x113   :  { %1039 = vmatpush1.bf16.msra.mxu0 %v2247_v41  ;;  %v1102_v41 = vrot.slane %v1093_v39, %v2551_v51 }
 0x114   :  { %1040 = vmatprep.subr.bf16.mxu0 %v2252_v42 }
 0x117   :  { %1041 = vmatpush1.bf16.msra.mxu0 %v2250_v43 }
 0x118   :  { %1042 = vmatprep.subr.bf16.mxu0 %v2255_v44 }
 0x11b   :  { %1043 = vmatpush1.bf16.msra.mxu0 %v2253_v45 }
 0x11c   :  { %1044 = vmatprep.subr.bf16.mxu0 %v2258_v46 }
 0x11f   :  { %1045 = vmatpush1.bf16.msra.mxu0 %v2256_v47 }
 0x120   :  { %1046 = vmatprep.subr.bf16.mxu0 %v2261_v48 }
 0x123   :  { %1047 = vmatpush1.bf16.msra.mxu0 %v2259_v49 }
 0x126   :  { %1049 = vmatmul.mubr.bf16.vlgmr.msra.gmra.mrb[0].mxu0 %v242_v52 }
 0x1f9   :  { %v1050_v62 = vpop.f32.mrb[0].mxu0 }
 0x1fa   :  { %v2050_v63 = vadd.f32 %v1050_v62, %v188_v60  ;;  %v1052_v0 = vpop.f32.mrb[1].mxu0  ;;  %v2369_v60 = vld [vmem:[%s2674_s5 + $0x34] ss:$8 sps:$4 sm:$0xff]   ;;  %v2372_v62 = vld [vmem:[%s2674_s5 + $0x44] ss:$8 sps:$4 sm:$0xff]  }
 0x1fb   :  { %v2051_v1 = vadd.f32 %v1052_v0, %v192_v61  ;;  %v1054_v2 = vpop.f32.mrb[2].mxu0  ;;  %v2367_v61 = vld [vmem:[%s2674_s5 + $0x30] ss:$8 sps:$4 sm:$0xff]   ;;  %v2375_v0 = vld [vmem:[%s2674_s5 + $0x54] ss:$8 sps:$4 sm:$0xff]  }
 0x1fc   :  { %v1057_v3 = vmax.f32 %v2050_v63, 0.0  ;;  %v1055_v4 = vpop.f32.mrb[3].mxu0  ;;  %v2370_v63 = vld [vmem:[%s2674_s5 + $0x40] ss:$8 sps:$4 sm:$0xff]   ;;  %v2378_v2 = vld [vmem:[%s2674_s5 + $0x64] ss:$8 sps:$4 sm:$0xff]  }
 0x1fd   :  { %v1058_v5 = vmax.f32 %v2051_v1, 0.0  ;;  %v2373_v1 = vld [vmem:[%s2674_s5 + $0x50] ss:$8 sps:$4 sm:$0xff]   ;;  %v2381_v4 = vld [vmem:[%s2674_s5 + $0x74] ss:$8 sps:$4 sm:$0xff]  }
 0x1fe   :  { %v1059_v8 = vpack.c.bf16 %v1057_v3, %v1057_v3  ;;  %v2376_v3 = vld [vmem:[%s2674_s5 + $0x60] ss:$8 sps:$4 sm:$0xff]  }
 0x1ff   :  { %v1060_v6 = vpack.c.bf16 %v1058_v5, %v1058_v5  ;;  %v2379_v5 = vld [vmem:[%s2674_s5 + $0x70] ss:$8 sps:$4 sm:$0xff]  }
 0x201   :  { %1297 = vmatprep.mubr.bf16.mxu1 %v1060_v6  ;;  %v2384_v6 = vld [vmem:[%s2674_s5 + $0x84] ss:$8 sps:$4 sm:$0xff]  }
 0x202   :  { %1298 = vmatmul.mubr.bf16.vlgmr.msra.gmra.mrb[0].mxu1 %v1059_v8  ;;  %v2387_v8 = vld [vmem:[%s2674_s5 + $0x94] ss:$8 sps:$4 sm:$0xff]  }
 0x203   :  { %1517 = vmatpush1.bf16.msra.mxu1 %v2310_v7  ;;  %v2382_v7 = vld [vmem:[%s2674_s5 + $0x80] ss:$8 sps:$4 sm:$0xff]  }
 0x204   :  { %1518 = vmatprep.subr.bf16.mxu1 %v2315_v9  ;;  %v2385_v9 = vld [vmem:[%s2674_s5 + $0x90] ss:$8 sps:$4 sm:$0xff]  }
 0x207   :  { %1519 = vmatpush1.bf16.msra.mxu1 %v2313_v12  ;;  %v2390_v12 = vld [vmem:[%s2674_s5 + $0xa4] ss:$8 sps:$4 sm:$0xff]  }
 0x208   :  { %1520 = vmatprep.subr.bf16.mxu1 %v2318_v10  ;;  %v2388_v10 = vld [vmem:[%s2674_s5 + $0xa0] ss:$8 sps:$4 sm:$0xff]  }
 0x20b   :  { %1521 = vmatpush1.bf16.msra.mxu1 %v2316_v11  ;;  %v2393_v11 = vld [vmem:[%s2674_s5 + $0xb4] ss:$8 sps:$4 sm:$0xff]  }
 0x20c   :  { %1522 = vmatprep.subr.bf16.mxu1 %v2321_v13  ;;  %v2391_v13 = vld [vmem:[%s2674_s5 + $0xb0] ss:$8 sps:$4 sm:$0xff]  }
 0x20f   :  { %1523 = vmatpush1.bf16.msra.mxu1 %v2319_v14  ;;  %v2396_v14 = vld [vmem:[%s2674_s5 + $0xc4] ss:$8 sps:$4 sm:$0xff]  }
 0x210   :  { %1524 = vmatprep.subr.bf16.mxu1 %v2324_v15  ;;  %v2394_v15 = vld [vmem:[%s2674_s5 + $0xc0] ss:$8 sps:$4 sm:$0xff]  }
 0x213   :  { %1525 = vmatpush1.bf16.msra.mxu1 %v2322_v16  ;;  %v2399_v16 = vld [vmem:[%s2674_s5 + $0xd4] ss:$8 sps:$4 sm:$0xff]  }
 0x214   :  { %1526 = vmatprep.subr.bf16.mxu1 %v2327_v17  ;;  %v2397_v17 = vld [vmem:[%s2674_s5 + $0xd0] ss:$8 sps:$4 sm:$0xff]  }
 0x217   :  { %1527 = vmatpush1.bf16.msra.mxu1 %v2325_v18  ;;  %v2402_v18 = vld [vmem:[%s2674_s5 + $0xe4] ss:$8 sps:$4 sm:$0xff]  }
 0x218   :  { %1528 = vmatprep.subr.bf16.mxu1 %v2330_v19  ;;  %v2400_v19 = vld [vmem:[%s2674_s5 + $0xe0] ss:$8 sps:$4 sm:$0xff]  }
 0x21b   :  { %1529 = vmatpush1.bf16.msra.mxu1 %v2328_v20  ;;  %v2405_v20 = vld [vmem:[%s2674_s5 + $0xf4] ss:$8 sps:$4 sm:$0xff]  }
 0x21c   :  { %1530 = vmatprep.subr.bf16.mxu1 %v2333_v21  ;;  %v2403_v21 = vld [vmem:[%s2674_s5 + $0xf0] ss:$8 sps:$4 sm:$0xff]  }
 0x21f   :  { %1531 = vmatpush1.bf16.msra.mxu1 %v2331_v22  ;;  %v1984_v22 = vld [vmem:[%s2673_s4 + $0x2] sm:$0x3] }
 0x220   :  { %1532 = vmatprep.subr.bf16.mxu1 %v2336_v23  ;;  %v1349_v23 = vrot.slane %v1984_v22, %v2545_v58 }
 0x223   :  { %1533 = vmatpush1.bf16.msra.mxu1 %v2334_v24  ;;  %v1353_v24 = vrot.slane %v1984_v22, %v2551_v51 }
 0x224   :  { %1534 = vmatprep.subr.bf16.mxu1 %v2339_v25 }
 0x227   :  { %1535 = vmatpush1.bf16.msra.mxu1 %v2337_v26 }
 0x228   :  { %1536 = vmatprep.subr.bf16.mxu1 %v2342_v27 }
 0x22b   :  { %1537 = vmatpush1.bf16.msra.mxu1 %v2340_v28 }
 0x22c   :  { %1538 = vmatprep.subr.bf16.mxu1 %v2345_v50 }
 0x22f   :  { %1539 = vmatpush1.bf16.msra.mxu1 %v2343_v29 }
 0x230   :  { %1540 = vmatprep.subr.bf16.mxu1 %v2348_v30 }
 0x233   :  { %1541 = vmatpush1.bf16.msra.mxu1 %v2346_v31 }
 0x234   :  { %1542 = vmatprep.subr.bf16.mxu1 %v2351_v32 }
 0x237   :  { %1543 = vmatpush1.bf16.msra.mxu1 %v2349_v33 }
 0x238   :  { %1544 = vmatprep.subr.bf16.mxu1 %v2354_v34  ;;  %v1593_v34 = vld [vmem:[%s2675_s6] sm:$0x3] }
 0x23b   :  { %1545 = vmatpush1.bf16.msra.mxu1 %v2352_v35  ;;  %v1598_v35 = vrot.slane %v1593_v34, %v2545_v58 }
 0x23c   :  { %1546 = vmatprep.subr.bf16.mxu1 %v2357_v36  ;;  %v1602_v36 = vrot.slane %v1593_v34, %v2551_v51 }
 0x23f   :  { %1547 = vmatpush1.bf16.msra.mxu1 %v2355_v37 }
 0x240   :  { %1765 = vmatprep.subr.bf16.mxu1 %v2360_v38 }
 0x2d5   :  { %v1299_v42 = vpop.f32.mrb[0].mxu1 }
 0x2d6   :  { %v1300_v43 = vadd.f32 %v1299_v42, %v1098_v40  ;;  %v1301_v44 = vpop.f32.mrb[1].mxu1 }
 0x2d7   :  { %v1302_v45 = vadd.f32 %v1301_v44, %v1102_v41  ;;  %v1303_v46 = vpop.f32.mrb[2].mxu1 }
 0x2d8   :  { %v1306_v47 = vmax.f32 %v1300_v43, 0.0  ;;  %v1304_v48 = vpop.f32.mrb[3].mxu1 }
 0x2d9   :  { %v1307_v49 = vmax.f32 %v1302_v45, 0.0 }
 0x2da   :  { %v1308_v54 = vpack.c.bf16 %v1306_v47, %v1306_v47 }
 0x2db   :  { %v1309_v52 = vpack.c.bf16 %v1307_v49, %v1307_v49 }
 0x2dd   :  { %1548 = vmatprep.mubr.bf16.mxu1 %v1309_v52 }
 0x2de   :  { %1549 = vmatmul.mubr.bf16.vlgmr.msra.gmra.mrb[4].mxu1 %v1308_v54 }
 0x2df   :  { %1766 = vmatpush1.bf16.msra.mxu1 %v2358_v53 }
 0x2e0   :  { %1767 = vmatprep.subr.bf16.mxu1 %v2363_v55 }
 0x2e3   :  { %1768 = vmatpush1.bf16.msra.mxu1 %v2361_v56 }
 0x2e4   :  { %1769 = vmatprep.subr.bf16.mxu1 %v2366_v57 }
 0x2e7   :  { %1770 = vmatpush1.bf16.msra.mxu1 %v2364_v59 }
 0x2e8   :  { %1771 = vmatprep.subr.bf16.mxu1 %v2369_v60 }
 0x2eb   :  { %1772 = vmatpush1.bf16.msra.mxu1 %v2367_v61 }
 0x2ec   :  { %1773 = vmatprep.subr.bf16.mxu1 %v2372_v62 }
 0x2ef   :  { %1774 = vmatpush1.bf16.msra.mxu1 %v2370_v63 }
 0x2f0   :  { %1775 = vmatprep.subr.bf16.mxu1 %v2375_v0 }
 0x2f3   :  { %1776 = vmatpush1.bf16.msra.mxu1 %v2373_v1 }
 0x2f4   :  { %1777 = vmatprep.subr.bf16.mxu1 %v2378_v2 }
 0x2f7   :  { %1778 = vmatpush1.bf16.msra.mxu1 %v2376_v3 }
 0x2f8   :  { %1779 = vmatprep.subr.bf16.mxu1 %v2381_v4 }
 0x2fb   :  { %1780 = vmatpush1.bf16.msra.mxu1 %v2379_v5 }
 0x2fc   :  { %1781 = vmatprep.subr.bf16.mxu1 %v2384_v6 }
 0x2ff   :  { %1782 = vmatpush1.bf16.msra.mxu1 %v2382_v7 }
 0x300   :  { %1783 = vmatprep.subr.bf16.mxu1 %v2387_v8 }
 0x303   :  { %1784 = vmatpush1.bf16.msra.mxu1 %v2385_v9 }
 0x304   :  { %1785 = vmatprep.subr.bf16.mxu1 %v2390_v12 }
 0x307   :  { %1786 = vmatpush1.bf16.msra.mxu1 %v2388_v10 }
 0x308   :  { %1787 = vmatprep.subr.bf16.mxu1 %v2393_v11 }
 0x30b   :  { %1788 = vmatpush1.bf16.msra.mxu1 %v2391_v13 }
 0x30c   :  { %1789 = vmatprep.subr.bf16.mxu1 %v2396_v14 }
 0x30f   :  { %1790 = vmatpush1.bf16.msra.mxu1 %v2394_v15 }
 0x310   :  { %1791 = vmatprep.subr.bf16.mxu1 %v2399_v16 }
 0x313   :  { %1792 = vmatpush1.bf16.msra.mxu1 %v2397_v17 }
 0x314   :  { %1793 = vmatprep.subr.bf16.mxu1 %v2402_v18 }
 0x317   :  { %1794 = vmatpush1.bf16.msra.mxu1 %v2400_v19 }
 0x318   :  { %1795 = vmatprep.subr.bf16.mxu1 %v2405_v20 }
 0x31b   :  { %1796 = vmatpush1.bf16.msra.mxu1 %v2403_v21 }
 0x3b1   :  { %v1550_v25 = vpop.f32.mrb[4].mxu1 }
 0x3b2   :  { %v1551_v26 = vadd.f32 %v1550_v25, %v1349_v23  ;;  %v1552_v27 = vpop.f32.mrb[5].mxu1 }
 0x3b3   :  { %v1553_v28 = vadd.f32 %v1552_v27, %v1353_v24  ;;  %v1554_v50 = vpop.f32.mrb[6].mxu1 }
 0x3b4   :  { %v1557_v29 = vmax.f32 %v1551_v26, 0.0  ;;  %v1555_v30 = vpop.f32.mrb[7].mxu1 }
 0x3b5   :  { %v1558_v31 = vmax.f32 %v1553_v28, 0.0 }
 0x3b6   :  { %v1559_v33 = vpack.c.bf16 %v1557_v29, %v1557_v29 }
 0x3b7   :  { %v1560_v32 = vpack.c.bf16 %v1558_v31, %v1558_v31 }
 0x3b9   :  { %1797 = vmatprep.mubr.bf16.mxu1 %v1560_v32 }
 0x3ba   :  { %1798 = vmatmul.mubr.bf16.vlgmr.msra.gmra.mrb[8].mxu1 %v1559_v33 }
 0x48d   :  { %v1799_v37 = vpop.f32.mrb[8].mxu1 }
 0x48e   :  { %v1800_v38 = vadd.f32 %v1799_v37, %v1598_v35  ;;  %v1801_v39 = vpop.f32.mrb[9].mxu1 }
 0x48f   :  { %v1802_v40 = vadd.f32 %v1801_v39, %v1602_v36  ;;  %v1803_v41 = vpop.f32.mrb[10].mxu1 }
 0x490   :  { %v1804_v42 = vpop.f32.mrb[11].mxu1 }
 0x491   :  { %v1808_v43 = vcombine.low %v1800_v38, %v1802_v40 }
 0x493   :  { %2049 = vst.sshfl [vmem:[%s2676_s7] sm:$0x33 pattern:$0x76325410] %v1808_v43 }
 0x494   :  { %1822 = vsyncpa [#allocation3], 1 }
 0x495   :  { %1823 = vsyncpa [#allocation5], 1 }

</bundles_post_ra>
